<compile_context>
chip_gen: v5e
topology: v5e:2x2
jax: 0.10.0
libtpu: 0.0.40
codegen_flags: <defaults>
</compile_context>

<pallas_src>
import functools

import jax
import jax.numpy as jnp
from jax import lax
from jax.experimental import pallas as pl
from jax.experimental.pallas import tpu as pltpu


def _block_kernel(x_ref, pre_ref, post_ref, *rest,
                  Cin, Cm, Cout, W, lanes, stride, residual):
    """One grid step = B whole images folded onto the lane axis.

    x_ref   : (Cin, lanes)                input, channels on sublanes, B*H*W pixels on lanes
    pre_ref : (1+Cin+9, Cm, lanes)        [0]=BN1 bias plane, [1:1+Cin]=1x1-expansion weight
                                          planes (BN1 scale folded), [1+Cin:]=depthwise tap
                                          planes (BN2 scale + zero-padding masks folded)
    post_ref: (2+Cm, Cpad, lanes_out)     [0]=BN2 bias plane, [1:1+Cm]=1x1-projection weight
                                          planes (BN3 scale folded), [1+Cm]=BN3 bias plane
    sel_ref : (lanes, lanes_out)          block-diagonal one-hot stride selection (stride>1 only)
    o_ref   : (Cout, lanes_out)           output -> single lane-dense store (>=128 lanes)
    """
    if stride > 1:
        sel_ref, o_ref = rest
    else:
        (o_ref,) = rest
        sel_ref = None
    f32 = jnp.float32

    # ---- 1x1 expansion + folded BN1 + ReLU6: Cin plane FMAs on the VPU ------
    h = pre_ref[1] * x_ref[0:1, :]
    for k in range(1, Cin):
        h = h + pre_ref[1 + k] * x_ref[k:k + 1, :]
    h = jnp.clip(h + pre_ref[0], 0.0, 6.0)                      # (Cm, lanes)

    # ---- depthwise 3x3, padding=1: 8 XLU lane-rolls, masks folded into ------
    # ---- the per-tap weight planes (no selects, no iota, no leakage between -
    # ---- the images sharing the lane axis) ----------------------------------
    acc = None
    for t in range(9):
        di, dj = divmod(t, 3)
        off = (di - 1) * W + (dj - 1)                           # flat source offset
        tap = h if off == 0 else pltpu.roll(h, shift=(-off) % lanes, axis=1)
        term = pre_ref[1 + Cin + t] * tap
        acc = term if acc is None else acc + term               # (Cm, lanes)

    # ---- stride > 1: exact one-hot pixel selection on the (otherwise idle) --
    # ---- MXU, selection matrix precomputed in the wrapper -------------------
    if sel_ref is not None:
        acc = jnp.dot(acc, sel_ref[...], preferred_element_type=f32)

    # ---- + BN2 bias plane, ReLU6 --------------------------------------------
    a = jnp.clip(acc + post_ref[0][:Cm, :], 0.0, 6.0)           # (Cm, lanes_out)

    # ---- 1x1 projection + folded BN3: Cm plane FMAs on the VPU --------------
    # (switch to a bf16 MXU jnp.dot at real MobileNet widths, where Cm >= 64)
    out = post_ref[1][:Cout, :] * a[0:1, :]
    for m in range(1, Cm):
        out = out + post_ref[1 + m][:Cout, :] * a[m:m + 1, :]
    out = out + post_ref[1 + Cm][:Cout, :]                      # BN3 bias plane

    if residual:
        out = out + x_ref[...]                                  # Cout == Cin here

    o_ref[...] = out.astype(o_ref.dtype)                        # one lane-dense store


def _pack_operands(params, *, Cin, Cm, Cout, H, W, stride, B):
    """Fold BN into the conv weights, pre-broadcast everything along the lane
    axis and pack it into two buffers (+ the stride-selection one-hot)."""
    f32 = jnp.float32
    HW = H * W
    Ho = (H + 2 - 3) // stride + 1
    Wo = (W + 2 - 3) // stride + 1
    HWo = Ho * Wo
    lanes, lanes_out = B * HW, B * HWo

    w1, dw, w3 = params["w1"], params["dw"], params["w3"]
    sb1, sb2, sb3 = params["sb1"], params["sb2"], params["sb3"]
    s1, b1 = sb1[:, 0], sb1[:, 1]
    s2, b2 = sb2[:, 0], sb2[:, 1]
    s3, b3 = sb3[:, 0], sb3[:, 1]

    # Per-lane (= per destination pixel, per image) row/col, replicated over
    # the B images folded onto the lane axis.
    lane = jnp.arange(lanes, dtype=jnp.int32)
    row = (lane // W) % H
    col = lane % W

    # "pre" planes: BN1 bias, Cin expansion-weight planes, 9 depthwise planes.
    pre = [jnp.broadcast_to(b1[:, None], (Cm, lanes))]
    w1s = w1 * s1[:, None]                                      # fold BN1 scale
    for k in range(Cin):
        pre.append(jnp.broadcast_to(w1s[:, k][:, None], (Cm, lanes)))
    dws = dw * s2[:, None]                                      # fold BN2 scale
    for t in range(9):
        di, dj = divmod(t, 3)
        ok = ((row + (di - 1) >= 0) & (row + (di - 1) < H) &
              (col + (dj - 1) >= 0) & (col + (dj - 1) < W)).astype(f32)
        pre.append(dws[:, t][:, None] * ok[None, :])            # padding mask folded in
    pre = jnp.stack(pre).astype(f32)                            # (1+Cin+9, Cm, lanes)

    # "post" planes: BN2 bias, Cm projection-weight planes, BN3 bias (row-padded).
    cpad = max(Cm, Cout)

    def pad_rows(p):
        return jnp.pad(p, ((0, cpad - p.shape[0]), (0, 0)))

    post = [pad_rows(jnp.broadcast_to(b2[:, None], (Cm, lanes_out)))]
    w3s = w3 * s3[:, None]                                      # fold BN3 scale
    for m in range(Cm):
        post.append(pad_rows(jnp.broadcast_to(w3s[:, m][:, None], (Cout, lanes_out))))
    post.append(pad_rows(jnp.broadcast_to(b3[:, None], (Cout, lanes_out))))
    post = jnp.stack(post).astype(f32)                          # (2+Cm, cpad, lanes_out)

    sel = None
    if stride > 1:
        # Block-diagonal one-hot: output lane (img, io, jo) <- input lane
        # (img, io*stride, jo*stride).  Exactly one 1.0 per column -> exact.
        q = jnp.arange(lanes_out, dtype=jnp.int32)
        img, r = q // HWo, q % HWo
        src = img * HW + (r // Wo) * (stride * W) + (r % Wo) * stride
        sel = (lane[:, None] == src[None, :]).astype(f32)       # (lanes, lanes_out)

    return pre, post, sel, (Ho, Wo)


@functools.partial(jax.jit, static_argnames=("i", "n", "s"))
def block_forward(x_nchw, params, *, i, n, s):
    """Pallas implementation of Block.forward.  x_nchw: (N, C, H, W) float32."""
    residual = (i != n - 1)
    stride = 1 if residual else s
    N, Cin, H, W = x_nchw.shape
    Cm = params["w1"].shape[0]
    Cout = params["w3"].shape[0]
    HW = H * W

    B = 2 if N % 2 == 0 else 1          # images folded onto the lane axis per step
    G = N // B                          # grid length (keep a multiple of 2 on v7x)

    pre, post, sel, (Ho, Wo) = _pack_operands(
        params, Cin=Cin, Cm=Cm, Cout=Cout, H=H, W=W, stride=stride, B=B)
    HWo = Ho * Wo
    lanes, lanes_out = B * HW, B * HWo

    # Channel-major with the batch folded onto lanes: (Cin, N*H*W).
    # One wrapper-side transpose = layout plumbing for lane-dense kernel ops.
    x_cl = x_nchw.transpose(1, 0, 2, 3).reshape(Cin, N * HW)

    kernel = functools.partial(_block_kernel, Cin=Cin, Cm=Cm, Cout=Cout, W=W,
                               lanes=lanes, stride=stride, residual=residual)

    in_specs = [
        pl.BlockSpec((Cin, lanes), lambda g: (0, g)),
        pl.BlockSpec(pre.shape, lambda g: (0, 0, 0)),
        pl.BlockSpec(post.shape, lambda g: (0, 0, 0)),
    ]
    args = [x_cl, pre, post]
    if stride > 1:
        in_specs.append(pl.BlockSpec(sel.shape, lambda g: (0, 0)))
        args.append(sel)

    flops = N * (2 * HW * Cin * Cm            # 1x1 expansion
                 + 2 * HW * 9 * Cm            # depthwise 3x3 (full resolution)
                 + 2 * HWo * Cm * Cout        # 1x1 projection
                 + 4 * HW * Cm + 2 * HWo * Cout)
    if stride > 1:
        flops += N * 2 * HW * HWo * Cm        # one-hot selection matmul
    bytes_accessed = 4 * (x_cl.size + Cout * N * HWo + pre.size + post.size
                          + (sel.size if sel is not None else 0))

    # NOTE: at real MobileNet resolutions, extend grid to (N-groups, H-tiles)
    # with a 1-row halo so the expanded (Cm, tileHW) intermediates (f32 or,
    # better, bf16 on v6e/v7x) stay well inside v7x's 64 MiB VMEM.
    out = pl.pallas_call(
        kernel,
        out_shape=jax.ShapeDtypeStruct((Cout, N * HWo), x_nchw.dtype),
        grid_spec=pltpu.PrefetchScalarGridSpec(
            num_scalar_prefetch=0,
            grid=(G,),
            in_specs=in_specs,
            out_specs=pl.BlockSpec((Cout, lanes_out), lambda g: (0, g)),
        ),
        compiler_params=pltpu.CompilerParams(
            dimension_semantics=("parallel",),
            vmem_limit_bytes=32 * 1024 * 1024),
        cost_estimate=pl.CostEstimate(flops=int(flops), transcendentals=0,
                                      bytes_accessed=int(bytes_accessed)),
    )(*args)

    return out.reshape(Cout, N, Ho, Wo).transpose(1, 0, 2, 3)


def init_params(key, p_c, t, c, i, n):
    """Deterministic synthetic parameters matching the PyTorch module shapes."""
    _c = c if i == n - 1 else p_c
    Cm = p_c * t
    ks = jax.random.split(key, 15)

    def bn_fold(k0, k1, k2, k3, ch):
        gamma = 1.0 + 0.1 * jax.random.normal(k0, (ch,), jnp.float32)
        beta = 0.05 * jax.random.normal(k1, (ch,), jnp.float32)
        mean = 0.1 * jax.random.normal(k2, (ch,), jnp.float32)
        var = jax.random.uniform(k3, (ch,), jnp.float32, 0.5, 1.5)
        scale = gamma / jnp.sqrt(var + 1e-5)
        bias = beta - mean * scale
        return jnp.stack([scale, bias], axis=1)                 # (ch, 2)

    w1_oihw = 0.2 * jax.random.normal(ks[0], (Cm, p_c, 1, 1), jnp.float32)
    dw_oihw = 0.2 * jax.random.normal(ks[1], (Cm, 1, 3, 3), jnp.float32)
    w3_oihw = 0.2 * jax.random.normal(ks[2], (_c, Cm, 1, 1), jnp.float32)

    params = dict(
        w1=w1_oihw[:, :, 0, 0],                                 # (Cm, p_c)
        dw=dw_oihw[:, 0, :, :].reshape(Cm, 9),                  # (Cm, 9)
        w3=w3_oihw[:, :, 0, 0],                                 # (_c, Cm)
        sb1=bn_fold(ks[3], ks[4], ks[5], ks[6], Cm),
        sb2=bn_fold(ks[7], ks[8], ks[9], ks[10], Cm),
        sb3=bn_fold(ks[11], ks[12], ks[13], ks[14], _c),
    )
    return params, (w1_oihw, dw_oihw, w3_oihw)


def block_reference(x_nchw, w1_oihw, dw_oihw, w3_oihw, sb1, sb2, sb3, *, i, n, s):
    """Pure-JAX (lax.conv) reference with identical semantics, for validation."""
    residual = (i != n - 1)
    stride = 1 if residual else s
    dn = ('NCHW', 'OIHW', 'NCHW')

    def bn_apply(y, sb):
        return y * sb[:, 0].reshape(1, -1, 1, 1) + sb[:, 1].reshape(1, -1, 1, 1)

    y = lax.conv_general_dilated(x_nchw, w1_oihw, (1, 1), 'VALID',
                                 dimension_numbers=dn)
    y = jnp.clip(bn_apply(y, sb1), 0.0, 6.0)
    Cm = dw_oihw.shape[0]
    y = lax.conv_general_dilated(y, dw_oihw, (stride, stride),
                                 ((1, 1), (1, 1)), dimension_numbers=dn,
                                 feature_group_count=Cm)
    y = jnp.clip(bn_apply(y, sb2), 0.0, 6.0)
    y = lax.conv_general_dilated(y, w3_oihw, (1, 1), 'VALID',
                                 dimension_numbers=dn)
    y = bn_apply(y, sb3)
    return y + x_nchw if residual else y


if __name__ == "__main__":
    # Block(p_c=4, i, t=2, c=8, n=2, s=2) at 16x16, batch 2.
    p_c, t, c, n, s = 4, 2, 8, 2, 2

    key = jax.random.PRNGKey(0)
    kx, kp0, kp1 = jax.random.split(key, 3)
    x = jax.random.normal(kx, (2, p_c, 16, 16), jnp.float32)    # NCHW, like PyTorch

    # i=0 (not last): stride 1, Cout=p_c, residual add.
    # i=n-1 (last)  : stride s=2, Cout=c, no residual.
    configs = [(0, (2, p_c, 16, 16)), (n - 1, (2, c, 8, 8))]
    for i, want_shape in configs:
        params, (w1o, dwo, w3o) = init_params(kp0 if i == 0 else kp1,
                                              p_c, t, c, i, n)
        out = jax.block_until_ready(block_forward(x, params, i=i, n=n, s=s))
        ref = block_reference(x, w1o, dwo, w3o,
                              params["sb1"], params["sb2"], params["sb3"],
                              i=i, n=n, s=s)
        assert out.shape == ref.shape == want_shape, (out.shape, ref.shape)
        err = float(jnp.max(jnp.abs(out - ref)))
        if err > 1e-4:
            raise SystemExit(f"mismatch vs reference (i={i}), max abs err = {err:e}")

    print("KERNEL_OK")
</pallas_src>

<mosaic_0001>
module attributes {stable_mosaic.version = 11 : i64} {
  func.func @_block_kernel(%arg0: i32, %arg1: memref<4x512xf32, #tpu.memory_space<vmem>>, %arg2: memref<14x8x512xf32, #tpu.memory_space<vmem>>, %arg3: memref<10x8x512xf32, #tpu.memory_space<vmem>>, %arg4: memref<4x512xf32, #tpu.memory_space<vmem>>) attributes {dimension_semantics = [#tpu.dimension_semantics<parallel>], iteration_bounds = array<i64: 1>, scalar_prefetch = 0 : i64, scratch_operands = 0 : i64, tpu.core_type = #tpu.core_type<tc>, window_params = [{transform_indices = @transform_0, window_bounds = array<i64: 4, 512>}, {pipeline_mode = #tpu.pipeline_mode<synchronous>, transform_indices = @transform_1, window_bounds = array<i64: 14, 8, 512>}, {pipeline_mode = #tpu.pipeline_mode<synchronous>, transform_indices = @transform_2, window_bounds = array<i64: 10, 8, 512>}, {transform_indices = @transform_3, window_bounds = array<i64: 4, 512>}]} {
    %c1 = arith.constant 1 : index
    %c0 = arith.constant 0 : index
    %c0_0 = arith.constant 0 : index
    %0 = vector.load %arg2[%c1, %c0, %c0_0] : memref<14x8x512xf32, #tpu.memory_space<vmem>>, vector<1x8x512xf32>
    %1 = vector.shape_cast %0 : vector<1x8x512xf32> to vector<8x512xf32>
    %c0_1 = arith.constant 0 : index
    %c0_2 = arith.constant 0 : index
    %2 = vector.load %arg1[%c0_1, %c0_2] : memref<4x512xf32, #tpu.memory_space<vmem>>, vector<1x512xf32>
    %3 = vector.broadcast %2 : vector<1x512xf32> to vector<8x512xf32>
    %4 = arith.mulf %1, %3 : vector<8x512xf32>
    %c2 = arith.constant 2 : index
    %c0_3 = arith.constant 0 : index
    %c0_4 = arith.constant 0 : index
    %5 = vector.load %arg2[%c2, %c0_3, %c0_4] : memref<14x8x512xf32, #tpu.memory_space<vmem>>, vector<1x8x512xf32>
    %6 = vector.shape_cast %5 : vector<1x8x512xf32> to vector<8x512xf32>
    %c1_5 = arith.constant 1 : index
    %c0_6 = arith.constant 0 : index
    %7 = vector.load %arg1[%c1_5, %c0_6] : memref<4x512xf32, #tpu.memory_space<vmem>>, vector<1x512xf32>
    %8 = vector.broadcast %7 : vector<1x512xf32> to vector<8x512xf32>
    %9 = arith.mulf %6, %8 : vector<8x512xf32>
    %10 = arith.addf %4, %9 : vector<8x512xf32>
    %c3 = arith.constant 3 : index
    %c0_7 = arith.constant 0 : index
    %c0_8 = arith.constant 0 : index
    %11 = vector.load %arg2[%c3, %c0_7, %c0_8] : memref<14x8x512xf32, #tpu.memory_space<vmem>>, vector<1x8x512xf32>
    %12 = vector.shape_cast %11 : vector<1x8x512xf32> to vector<8x512xf32>
    %c2_9 = arith.constant 2 : index
    %c0_10 = arith.constant 0 : index
    %13 = vector.load %arg1[%c2_9, %c0_10] : memref<4x512xf32, #tpu.memory_space<vmem>>, vector<1x512xf32>
    %14 = vector.broadcast %13 : vector<1x512xf32> to vector<8x512xf32>
    %15 = arith.mulf %12, %14 : vector<8x512xf32>
    %16 = arith.addf %10, %15 : vector<8x512xf32>
    %c4 = arith.constant 4 : index
    %c0_11 = arith.constant 0 : index
    %c0_12 = arith.constant 0 : index
    %17 = vector.load %arg2[%c4, %c0_11, %c0_12] : memref<14x8x512xf32, #tpu.memory_space<vmem>>, vector<1x8x512xf32>
    %18 = vector.shape_cast %17 : vector<1x8x512xf32> to vector<8x512xf32>
    %c3_13 = arith.constant 3 : index
    %c0_14 = arith.constant 0 : index
    %19 = vector.load %arg1[%c3_13, %c0_14] : memref<4x512xf32, #tpu.memory_space<vmem>>, vector<1x512xf32>
    %20 = vector.broadcast %19 : vector<1x512xf32> to vector<8x512xf32>
    %21 = arith.mulf %18, %20 : vector<8x512xf32>
    %22 = arith.addf %16, %21 : vector<8x512xf32>
    %c0_15 = arith.constant 0 : index
    %c0_16 = arith.constant 0 : index
    %c0_17 = arith.constant 0 : index
    %23 = vector.load %arg2[%c0_15, %c0_16, %c0_17] : memref<14x8x512xf32, #tpu.memory_space<vmem>>, vector<1x8x512xf32>
    %24 = vector.shape_cast %23 : vector<1x8x512xf32> to vector<8x512xf32>
    %25 = arith.addf %22, %24 : vector<8x512xf32>
    %cst = arith.constant 0.000000e+00 : f32
    %cst_18 = arith.constant 6.000000e+00 : f32
    %26 = vector.broadcast %cst : f32 to vector<8x512xf32>
    %27 = arith.maximumf %26, %25 : vector<8x512xf32>
    %28 = vector.broadcast %cst_18 : f32 to vector<8x512xf32>
    %29 = arith.minimumf %28, %27 : vector<8x512xf32>
    %c17_i32 = arith.constant 17 : i32
    %30 = tpu.dynamic_rotate %29 by %c17_i32 dim 1 : vector<8x512xf32>, i32 -> vector<8x512xf32>
    %c5 = arith.constant 5 : index
    %c0_19 = arith.constant 0 : index
    %c0_20 = arith.constant 0 : index
    %31 = vector.load %arg2[%c5, %c0_19, %c0_20] : memref<14x8x512xf32, #tpu.memory_space<vmem>>, vector<1x8x512xf32>
    %32 = vector.shape_cast %31 : vector<1x8x512xf32> to vector<8x512xf32>
    %33 = arith.mulf %32, %30 : vector<8x512xf32>
    %c16_i32 = arith.constant 16 : i32
    %34 = tpu.dynamic_rotate %29 by %c16_i32 dim 1 : vector<8x512xf32>, i32 -> vector<8x512xf32>
    %c6 = arith.constant 6 : index
    %c0_21 = arith.constant 0 : index
    %c0_22 = arith.constant 0 : index
    %35 = vector.load %arg2[%c6, %c0_21, %c0_22] : memref<14x8x512xf32, #tpu.memory_space<vmem>>, vector<1x8x512xf32>
    %36 = vector.shape_cast %35 : vector<1x8x512xf32> to vector<8x512xf32>
    %37 = arith.mulf %36, %34 : vector<8x512xf32>
    %38 = arith.addf %33, %37 : vector<8x512xf32>
    %c15_i32 = arith.constant 15 : i32
    %39 = tpu.dynamic_rotate %29 by %c15_i32 dim 1 : vector<8x512xf32>, i32 -> vector<8x512xf32>
    %c7 = arith.constant 7 : index
    %c0_23 = arith.constant 0 : index
    %c0_24 = arith.constant 0 : index
    %40 = vector.load %arg2[%c7, %c0_23, %c0_24] : memref<14x8x512xf32, #tpu.memory_space<vmem>>, vector<1x8x512xf32>
    %41 = vector.shape_cast %40 : vector<1x8x512xf32> to vector<8x512xf32>
    %42 = arith.mulf %41, %39 : vector<8x512xf32>
    %43 = arith.addf %38, %42 : vector<8x512xf32>
    %c1_i32 = arith.constant 1 : i32
    %44 = tpu.dynamic_rotate %29 by %c1_i32 dim 1 : vector<8x512xf32>, i32 -> vector<8x512xf32>
    %c8 = arith.constant 8 : index
    %c0_25 = arith.constant 0 : index
    %c0_26 = arith.constant 0 : index
    %45 = vector.load %arg2[%c8, %c0_25, %c0_26] : memref<14x8x512xf32, #tpu.memory_space<vmem>>, vector<1x8x512xf32>
    %46 = vector.shape_cast %45 : vector<1x8x512xf32> to vector<8x512xf32>
    %47 = arith.mulf %46, %44 : vector<8x512xf32>
    %48 = arith.addf %43, %47 : vector<8x512xf32>
    %c9 = arith.constant 9 : index
    %c0_27 = arith.constant 0 : index
    %c0_28 = arith.constant 0 : index
    %49 = vector.load %arg2[%c9, %c0_27, %c0_28] : memref<14x8x512xf32, #tpu.memory_space<vmem>>, vector<1x8x512xf32>
    %50 = vector.shape_cast %49 : vector<1x8x512xf32> to vector<8x512xf32>
    %51 = arith.mulf %50, %29 : vector<8x512xf32>
    %52 = arith.addf %48, %51 : vector<8x512xf32>
    %c511_i32 = arith.constant 511 : i32
    %53 = tpu.dynamic_rotate %29 by %c511_i32 dim 1 : vector<8x512xf32>, i32 -> vector<8x512xf32>
    %c10 = arith.constant 10 : index
    %c0_29 = arith.constant 0 : index
    %c0_30 = arith.constant 0 : index
    %54 = vector.load %arg2[%c10, %c0_29, %c0_30] : memref<14x8x512xf32, #tpu.memory_space<vmem>>, vector<1x8x512xf32>
    %55 = vector.shape_cast %54 : vector<1x8x512xf32> to vector<8x512xf32>
    %56 = arith.mulf %55, %53 : vector<8x512xf32>
    %57 = arith.addf %52, %56 : vector<8x512xf32>
    %c497_i32 = arith.constant 497 : i32
    %58 = tpu.dynamic_rotate %29 by %c497_i32 dim 1 : vector<8x512xf32>, i32 -> vector<8x512xf32>
    %c11 = arith.constant 11 : index
    %c0_31 = arith.constant 0 : index
    %c0_32 = arith.constant 0 : index
    %59 = vector.load %arg2[%c11, %c0_31, %c0_32] : memref<14x8x512xf32, #tpu.memory_space<vmem>>, vector<1x8x512xf32>
    %60 = vector.shape_cast %59 : vector<1x8x512xf32> to vector<8x512xf32>
    %61 = arith.mulf %60, %58 : vector<8x512xf32>
    %62 = arith.addf %57, %61 : vector<8x512xf32>
    %c496_i32 = arith.constant 496 : i32
    %63 = tpu.dynamic_rotate %29 by %c496_i32 dim 1 : vector<8x512xf32>, i32 -> vector<8x512xf32>
    %c12 = arith.constant 12 : index
    %c0_33 = arith.constant 0 : index
    %c0_34 = arith.constant 0 : index
    %64 = vector.load %arg2[%c12, %c0_33, %c0_34] : memref<14x8x512xf32, #tpu.memory_space<vmem>>, vector<1x8x512xf32>
    %65 = vector.shape_cast %64 : vector<1x8x512xf32> to vector<8x512xf32>
    %66 = arith.mulf %65, %63 : vector<8x512xf32>
    %67 = arith.addf %62, %66 : vector<8x512xf32>
    %c495_i32 = arith.constant 495 : i32
    %68 = tpu.dynamic_rotate %29 by %c495_i32 dim 1 : vector<8x512xf32>, i32 -> vector<8x512xf32>
    %c13 = arith.constant 13 : index
    %c0_35 = arith.constant 0 : index
    %c0_36 = arith.constant 0 : index
    %69 = vector.load %arg2[%c13, %c0_35, %c0_36] : memref<14x8x512xf32, #tpu.memory_space<vmem>>, vector<1x8x512xf32>
    %70 = vector.shape_cast %69 : vector<1x8x512xf32> to vector<8x512xf32>
    %71 = arith.mulf %70, %68 : vector<8x512xf32>
    %72 = arith.addf %67, %71 : vector<8x512xf32>
    %c0_37 = arith.constant 0 : index
    %c0_38 = arith.constant 0 : index
    %c0_39 = arith.constant 0 : index
    %73 = vector.load %arg3[%c0_37, %c0_38, %c0_39] : memref<10x8x512xf32, #tpu.memory_space<vmem>>, vector<1x8x512xf32>
    %74 = vector.shape_cast %73 : vector<1x8x512xf32> to vector<8x512xf32>
    %75 = arith.addf %72, %74 : vector<8x512xf32>
    %cst_40 = arith.constant 0.000000e+00 : f32
    %cst_41 = arith.constant 6.000000e+00 : f32
    %76 = vector.broadcast %cst_40 : f32 to vector<8x512xf32>
    %77 = arith.maximumf %76, %75 : vector<8x512xf32>
    %78 = vector.broadcast %cst_41 : f32 to vector<8x512xf32>
    %79 = arith.minimumf %78, %77 : vector<8x512xf32>
    %c1_42 = arith.constant 1 : index
    %c0_43 = arith.constant 0 : index
    %c0_44 = arith.constant 0 : index
    %80 = vector.load %arg3[%c1_42, %c0_43, %c0_44] : memref<10x8x512xf32, #tpu.memory_space<vmem>>, vector<1x8x512xf32>
    %81 = vector.shape_cast %80 : vector<1x8x512xf32> to vector<8x512xf32>
    %82 = vector.extract_strided_slice %81 {offsets = [0, 0], sizes = [4, 512], strides = [1, 1]} : vector<8x512xf32> to vector<4x512xf32>
    %83 = vector.extract_strided_slice %79 {offsets = [0, 0], sizes = [1, 512], strides = [1, 1]} : vector<8x512xf32> to vector<1x512xf32>
    %84 = vector.broadcast %83 : vector<1x512xf32> to vector<4x512xf32>
    %85 = arith.mulf %82, %84 : vector<4x512xf32>
    %c2_45 = arith.constant 2 : index
    %c0_46 = arith.constant 0 : index
    %c0_47 = arith.constant 0 : index
    %86 = vector.load %arg3[%c2_45, %c0_46, %c0_47] : memref<10x8x512xf32, #tpu.memory_space<vmem>>, vector<1x8x512xf32>
    %87 = vector.shape_cast %86 : vector<1x8x512xf32> to vector<8x512xf32>
    %88 = vector.extract_strided_slice %87 {offsets = [0, 0], sizes = [4, 512], strides = [1, 1]} : vector<8x512xf32> to vector<4x512xf32>
    %89 = vector.extract_strided_slice %79 {offsets = [1, 0], sizes = [1, 512], strides = [1, 1]} : vector<8x512xf32> to vector<1x512xf32>
    %90 = vector.broadcast %89 : vector<1x512xf32> to vector<4x512xf32>
    %91 = arith.mulf %88, %90 : vector<4x512xf32>
    %92 = arith.addf %85, %91 : vector<4x512xf32>
    %c3_48 = arith.constant 3 : index
    %c0_49 = arith.constant 0 : index
    %c0_50 = arith.constant 0 : index
    %93 = vector.load %arg3[%c3_48, %c0_49, %c0_50] : memref<10x8x512xf32, #tpu.memory_space<vmem>>, vector<1x8x512xf32>
    %94 = vector.shape_cast %93 : vector<1x8x512xf32> to vector<8x512xf32>
    %95 = vector.extract_strided_slice %94 {offsets = [0, 0], sizes = [4, 512], strides = [1, 1]} : vector<8x512xf32> to vector<4x512xf32>
    %96 = vector.extract_strided_slice %79 {offsets = [2, 0], sizes = [1, 512], strides = [1, 1]} : vector<8x512xf32> to vector<1x512xf32>
    %97 = vector.broadcast %96 : vector<1x512xf32> to vector<4x512xf32>
    %98 = arith.mulf %95, %97 : vector<4x512xf32>
    %99 = arith.addf %92, %98 : vector<4x512xf32>
    %c4_51 = arith.constant 4 : index
    %c0_52 = arith.constant 0 : index
    %c0_53 = arith.constant 0 : index
    %100 = vector.load %arg3[%c4_51, %c0_52, %c0_53] : memref<10x8x512xf32, #tpu.memory_space<vmem>>, vector<1x8x512xf32>
    %101 = vector.shape_cast %100 : vector<1x8x512xf32> to vector<8x512xf32>
    %102 = vector.extract_strided_slice %101 {offsets = [0, 0], sizes = [4, 512], strides = [1, 1]} : vector<8x512xf32> to vector<4x512xf32>
    %103 = vector.extract_strided_slice %79 {offsets = [3, 0], sizes = [1, 512], strides = [1, 1]} : vector<8x512xf32> to vector<1x512xf32>
    %104 = vector.broadcast %103 : vector<1x512xf32> to vector<4x512xf32>
    %105 = arith.mulf %102, %104 : vector<4x512xf32>
    %106 = arith.addf %99, %105 : vector<4x512xf32>
    %c5_54 = arith.constant 5 : index
    %c0_55 = arith.constant 0 : index
    %c0_56 = arith.constant 0 : index
    %107 = vector.load %arg3[%c5_54, %c0_55, %c0_56] : memref<10x8x512xf32, #tpu.memory_space<vmem>>, vector<1x8x512xf32>
    %108 = vector.shape_cast %107 : vector<1x8x512xf32> to vector<8x512xf32>
    %109 = vector.extract_strided_slice %108 {offsets = [0, 0], sizes = [4, 512], strides = [1, 1]} : vector<8x512xf32> to vector<4x512xf32>
    %110 = vector.extract_strided_slice %79 {offsets = [4, 0], sizes = [1, 512], strides = [1, 1]} : vector<8x512xf32> to vector<1x512xf32>
    %111 = vector.broadcast %110 : vector<1x512xf32> to vector<4x512xf32>
    %112 = arith.mulf %109, %111 : vector<4x512xf32>
    %113 = arith.addf %106, %112 : vector<4x512xf32>
    %c6_57 = arith.constant 6 : index
    %c0_58 = arith.constant 0 : index
    %c0_59 = arith.constant 0 : index
    %114 = vector.load %arg3[%c6_57, %c0_58, %c0_59] : memref<10x8x512xf32, #tpu.memory_space<vmem>>, vector<1x8x512xf32>
    %115 = vector.shape_cast %114 : vector<1x8x512xf32> to vector<8x512xf32>
    %116 = vector.extract_strided_slice %115 {offsets = [0, 0], sizes = [4, 512], strides = [1, 1]} : vector<8x512xf32> to vector<4x512xf32>
    %117 = vector.extract_strided_slice %79 {offsets = [5, 0], sizes = [1, 512], strides = [1, 1]} : vector<8x512xf32> to vector<1x512xf32>
    %118 = vector.broadcast %117 : vector<1x512xf32> to vector<4x512xf32>
    %119 = arith.mulf %116, %118 : vector<4x512xf32>
    %120 = arith.addf %113, %119 : vector<4x512xf32>
    %c7_60 = arith.constant 7 : index
    %c0_61 = arith.constant 0 : index
    %c0_62 = arith.constant 0 : index
    %121 = vector.load %arg3[%c7_60, %c0_61, %c0_62] : memref<10x8x512xf32, #tpu.memory_space<vmem>>, vector<1x8x512xf32>
    %122 = vector.shape_cast %121 : vector<1x8x512xf32> to vector<8x512xf32>
    %123 = vector.extract_strided_slice %122 {offsets = [0, 0], sizes = [4, 512], strides = [1, 1]} : vector<8x512xf32> to vector<4x512xf32>
    %124 = vector.extract_strided_slice %79 {offsets = [6, 0], sizes = [1, 512], strides = [1, 1]} : vector<8x512xf32> to vector<1x512xf32>
    %125 = vector.broadcast %124 : vector<1x512xf32> to vector<4x512xf32>
    %126 = arith.mulf %123, %125 : vector<4x512xf32>
    %127 = arith.addf %120, %126 : vector<4x512xf32>
    %c8_63 = arith.constant 8 : index
    %c0_64 = arith.constant 0 : index
    %c0_65 = arith.constant 0 : index
    %128 = vector.load %arg3[%c8_63, %c0_64, %c0_65] : memref<10x8x512xf32, #tpu.memory_space<vmem>>, vector<1x8x512xf32>
    %129 = vector.shape_cast %128 : vector<1x8x512xf32> to vector<8x512xf32>
    %130 = vector.extract_strided_slice %129 {offsets = [0, 0], sizes = [4, 512], strides = [1, 1]} : vector<8x512xf32> to vector<4x512xf32>
    %131 = vector.extract_strided_slice %79 {offsets = [7, 0], sizes = [1, 512], strides = [1, 1]} : vector<8x512xf32> to vector<1x512xf32>
    %132 = vector.broadcast %131 : vector<1x512xf32> to vector<4x512xf32>
    %133 = arith.mulf %130, %132 : vector<4x512xf32>
    %134 = arith.addf %127, %133 : vector<4x512xf32>
    %c9_66 = arith.constant 9 : index
    %c0_67 = arith.constant 0 : index
    %c0_68 = arith.constant 0 : index
    %135 = vector.load %arg3[%c9_66, %c0_67, %c0_68] : memref<10x8x512xf32, #tpu.memory_space<vmem>>, vector<1x8x512xf32>
    %136 = vector.shape_cast %135 : vector<1x8x512xf32> to vector<8x512xf32>
    %137 = vector.extract_strided_slice %136 {offsets = [0, 0], sizes = [4, 512], strides = [1, 1]} : vector<8x512xf32> to vector<4x512xf32>
    %138 = arith.addf %134, %137 : vector<4x512xf32>
    %c0_69 = arith.constant 0 : index
    %c0_70 = arith.constant 0 : index
    %139 = vector.load %arg1[%c0_69, %c0_70] : memref<4x512xf32, #tpu.memory_space<vmem>>, vector<4x512xf32>
    %140 = arith.addf %138, %139 : vector<4x512xf32>
    %c0_71 = arith.constant 0 : index
    %c0_72 = arith.constant 0 : index
    %141 = vector.load %arg4[%c0_71, %c0_72] : memref<4x512xf32, #tpu.memory_space<vmem>>, vector<4x512xf32>
    tpu.vector_store %arg4[%c0_71, %c0_72], %140 {strides = array<i32>} : memref<4x512xf32, #tpu.memory_space<vmem>>, vector<4x512xf32>,
    return
  }
  func.func @transform_0(%arg0: i32) -> (i32, i32) {
    %c0_i32 = arith.constant 0 : i32
    %c0_i32_0 = arith.constant 0 : i32
    return %c0_i32, %arg0 : i32, i32
  }
  func.func @transform_1(%arg0: i32) -> (i32, i32, i32) {
    %c0_i32 = arith.constant 0 : i32
    %c0_i32_0 = arith.constant 0 : i32
    %c0_i32_1 = arith.constant 0 : i32
    %c0_i32_2 = arith.constant 0 : i32
    return %c0_i32, %c0_i32_0, %c0_i32_1 : i32, i32, i32
  }
  func.func @transform_2(%arg0: i32) -> (i32, i32, i32) {
    %c0_i32 = arith.constant 0 : i32
    %c0_i32_0 = arith.constant 0 : i32
    %c0_i32_1 = arith.constant 0 : i32
    %c0_i32_2 = arith.constant 0 : i32
    return %c0_i32, %c0_i32_0, %c0_i32_1 : i32, i32, i32
  }
  func.func @transform_3(%arg0: i32) -> (i32, i32) {
    %c0_i32 = arith.constant 0 : i32
    %c0_i32_0 = arith.constant 0 : i32
    return %c0_i32, %arg0 : i32, i32
  }
}

</mosaic_0001>

<bundles_post_ra>
// kernel: block_forward.1
= control target key start
LH: loop header
LB: loop body
LE: loop exit
PB: predicated region body
PF: predicated region fallthrough
CT: control target
= control target key end

     0   :  { %s632_s9 = smov 17   ;;  %s633_s10 = smov 16   ;;  %vm522_vm8 = vcmask 1043456   ;;  %s1219_s0 = inlined_call_operand.vmem [shape: f32[4,512], index: 0, kind: input, shape index: {}]   ;;  %s1220_s1 = inlined_call_operand.vmem [shape: f32[14,8,512], index: 1, kind: input, shape index: {}]   ;;  %s1221_s2 = inlined_call_operand.vmem [shape: f32[10,8,512], index: 2, kind: input, shape index: {}]   ;;  %s1222_s3 = inlined_call_operand.vmem [shape: f32[4,512], index: 3, kind: output, shape index: {}]  }
   0x1   :  { %v535_v0 = vld [vmem:[%s1220_s1 + $0x30] sm:$0xff]  ;;  %v19_v1 = vld [vmem:[%s1219_s0] ss:$4 sm:$0xf]  ;;  %v536_v29 = vld [vmem:[%s1220_s1 + $0x38] sm:$0xff]  ;;  %s635_s11 = smov 1  }
   0x2   :  { %v23_v2 = vperm.slane %v19_v1, 2  ;;  %v539_v3 = vld [vmem:[%s1220_s1 + $0x50] sm:$0xff]  ;;  %v541_v4 = vld [vmem:[%s1219_s0 + $0x1] ss:$4 sm:$0xf]  ;;  %v21_v17 = vperm.slane %v19_v1, 0 }
   0x3   :  { %v544_v5 = vld [vmem:[%s1220_s1 + $0x70] sm:$0xff]  ;;  %v43_v6 = vperm.slane %v541_v4, 2  ;;  %v546_v7 = vld [vmem:[%s1219_s0 + $0x2] ss:$4 sm:$0xf]  ;;  %v41_v19 = vperm.slane %v541_v4, 0 }
   0x4   :  { %v549_v8 = vld [vmem:[%s1220_s1 + $0x90] sm:$0xff]  ;;  %v497_v9 = vld [vmem:[%s1219_s0] sm:$0xff]  ;;  %v31_v10 = vmul.f32 %v535_v0, %v23_v2  ;;  %v67_v11 = vperm.slane %v546_v7, 2  ;;  %v498_v13 = vld [vmem:[%s1219_s0 + $0x8] sm:$0xff]  ;;  %v65_v22 = vperm.slane %v546_v7, 0  ;;  %v24_v33 = vperm.slane %v19_v1, 3 }
   0x5   :  { %v551_v12 = vld [vmem:[%s1219_s0 + $0x3] ss:$4 sm:$0xf]  ;;  %v51_v15 = vmul.f32 %v539_v3, %v43_v6  ;;  %501 = vst [vmem:[#allocation1] ss:$2 sm:$0xff] %v497_v9  ;;  %v540_v30 = vld [vmem:[%s1220_s1 + $0x58] sm:$0xff] }
   0x6   :  { %v533_v14 = vld [vmem:[%s1220_s1 + $0x20] sm:$0xff]  ;;  %v91_v16 = vperm.slane %v551_v12, 2  ;;  %v75_v20 = vmul.f32 %v544_v5, %v67_v11  ;;  %503 = vst [vmem:[#allocation1 + $0x10] ss:$2 sm:$0xff] %v498_v13  ;;  %v89_v24 = vperm.slane %v551_v12, 0  ;;  %v44_v34 = vperm.slane %v541_v4, 3 }
   0x7   :  { %v537_v18 = vld [vmem:[%s1220_s1 + $0x40] sm:$0xff]  ;;  %v55_v25 = vadd.f32 %v51_v15, %v31_v10  ;;  %v29_v27 = vmul.f32 %v533_v14, %v21_v17  ;;  %v545_v35 = vld [vmem:[%s1220_s1 + $0x78] sm:$0xff]  ;;  %v68_v39 = vperm.slane %v546_v7, 3  ;;  %v92_v40 = vperm.slane %v551_v12, 3  ;;  %v534_v41 = vld [vmem:[%s1220_s1 + $0x28] sm:$0xff]  ;;  %s634_s0 = smov 15  }
   0x8   :  { %v542_v21 = vld [vmem:[%s1220_s1 + $0x60] sm:$0xff]  ;;  %v99_v26 = vmul.f32 %v549_v8, %v91_v16  ;;  %v49_v28 = vmul.f32 %v537_v18, %v41_v19  ;;  %v550_v36 = vld [vmem:[%s1220_s1 + $0x98] sm:$0xff]  ;;  %v538_v42 = vld [vmem:[%s1220_s1 + $0x48] sm:$0xff]  ;;  %v32_v44 = vmul.f32 %v536_v29, %v24_v33  ;;  %v52_v45 = vmul.f32 %v540_v30, %v44_v34  ;;  %s636_s12 = smov 127   ;;  %s637_s13 = smov 113  }
   0x9   :  { %v547_v23 = vld [vmem:[%s1220_s1 + $0x80] sm:$0xff]  ;;  %v73_v31 = vmul.f32 %v542_v21, %v65_v22  ;;  %v79_v37 = vadd.f32 %v75_v20, %v55_v25  ;;  %v107_v43 = vld [vmem:[%s1220_s1 + $0x10] sm:$0xff]  ;;  %v22_v46 = vperm.slane %v19_v1, 1  ;;  %v42_v47 = vperm.slane %v541_v4, 1  ;;  %v543_v52 = vld [vmem:[%s1220_s1 + $0x68] sm:$0xff]  ;;  %s638_s14 = smov 112  }
   0xa   :  { %v97_v32 = vmul.f32 %v547_v23, %v89_v24  ;;  %v53_v38 = vadd.f32 %v49_v28, %v29_v27  ;;  %v76_v50 = vmul.f32 %v545_v35, %v68_v39  ;;  %v100_v51 = vmul.f32 %v550_v36, %v92_v40  ;;  %v105_v53 = vld [vmem:[%s1220_s1] sm:$0xff]  ;;  %v548_v58 = vld [vmem:[%s1220_s1 + $0x88] sm:$0xff]  ;;  %v108_v3 = vld [vmem:[%s1220_s1 + $0x18] sm:$0xff]  ;;  %s639_s15 = smov 111  }
   0xb   :  { %v103_v48 = vadd.f32 %v99_v26, %v79_v37  ;;  %v56_v54 = vadd.f32 %v52_v45, %v32_v44  ;;  %v30_v55 = vmul.f32 %v534_v41, %v22_v46  ;;  %v50_v56 = vmul.f32 %v538_v42, %v42_v47  ;;  %v106_v9 = vld [vmem:[%s1220_s1 + $0x8] sm:$0xff]  ;;  %v556_v40 = vld [vmem:[%s1220_s1 + $0xc0] sm:$0xff] }
   0xc   :  { %v77_v49 = vadd.f32 %v73_v31, %v53_v38  ;;  %v66_v57 = vperm.slane %v546_v7, 1  ;;  %v90_v61 = vperm.slane %v551_v12, 1  ;;  %v129_v34 = vlaneseq  ;;  %v560_v47 = vld [vmem:[%s1220_s1 + $0xe0] sm:$0xff] }
   0xd   :  { %v111_v59 = vadd.f32 %v107_v43, %v103_v48  ;;  %v80_v62 = vadd.f32 %v76_v50, %v56_v54  ;;  %v54_v63 = vadd.f32 %v50_v56, %v30_v55  ;;  %v552_v43 = vld [vmem:[%s1220_s1 + $0xa0] sm:$0xff] }
   0xe   :  { %v101_v60 = vadd.f32 %v97_v32, %v77_v49  ;;  %v74_v0 = vmul.f32 %v543_v52, %v66_v57  ;;  %v98_v4 = vmul.f32 %v548_v58, %v90_v61  ;;  %v802_v38 = vand.u32 127, %v129_v34  ;;  %v564_v50 = vld [vmem:[%s1220_s1 + $0x100] sm:$0xff] }
   0xf   :  { %v115_v1 = vmax.f32 %v111_v59, 0.0  ;;  %v104_v5 = vadd.f32 %v100_v51, %v80_v62  ;;  %v568_v57 = vld [vmem:[%s1220_s1 + $0x120] sm:$0xff] }
  0x10   :  { %v109_v2 = vadd.f32 %v105_v53, %v101_v60  ;;  %v78_v6 = vadd.f32 %v74_v0, %v54_v63  ;;  %vm153_vm0 = vcmp.lt.s32.totalorder %v802_v38, 16  ;;  %vm131_vm1 = vcmp.lt.s32.totalorder %v802_v38, 17  ;;  %v559_v60 = vld [vmem:[%s1220_s1 + $0xd8] sm:$0xff]  ;;  %v557_v0 = vld [vmem:[%s1220_s1 + $0xc8] sm:$0xff] }
  0x11   :  { %v735_v7 = vmin.f32 %v115_v1, 6.0  ;;  %v112_v10 = vadd.f32 %v108_v3, %v104_v5  ;;  %vm179_vm2 = vcmp.lt.s32.totalorder %v802_v38, 15  ;;  %vm205_vm3 = vcmp.lt.s32.totalorder %v802_v38, 1 }
  0x12   :  { %v113_v8 = vmax.f32 %v109_v2, 0.0  ;;  %v102_v11 = vadd.f32 %v98_v4, %v78_v6  ;;  %vm244_vm4 = vcmp.lt.s32.totalorder %v802_v38, 127  ;;  %v555_v2 = vld [vmem:[%s1220_s1 + $0xb8] sm:$0xff]  ;;  %vm270_vm5 = vcmp.lt.s32.totalorder %v802_v38, 113 }
  0x13   :  { %125 = vrot.lane.b32.xlu1 %v735_v7, %s632_s9  ;;  %v116_v13 = vmax.f32 %v112_v10, 0.0  ;;  %v563_v4 = vld [vmem:[%s1220_s1 + $0xf8] sm:$0xff]  ;;  %vm296_vm6 = vcmp.lt.s32.totalorder %v802_v38, 112  ;;  %vm322_vm7 = vcmp.lt.s32.totalorder %v802_v38, 111  ;;  %v341_v38 = vld [vmem:[%s1221_s2 + $0x8] sm:$0xff] }
  0x14   :  { %v741_v12 = vmin.f32 %v113_v8, 6.0  ;;  %v110_v14 = vadd.f32 %v106_v9, %v102_v11  ;;  %v553_v8 = vld [vmem:[%s1220_s1 + $0xa8] sm:$0xff]  ;;  %v572_v11 = vld [vmem:[%s1220_s1 + $0x140] sm:$0xff] }
  0x15   :  { %v745_v16 = vmin.f32 %v116_v13, 6.0  ;;  %v576_v13 = vld [vmem:[%s1220_s1 + $0x160] sm:$0xff] }
  0x16   :  { %121 = vrot.lane.b32.xlu0 %v741_v12, %s632_s9  ;;  %145 = vrot.lane.b32.xlu2 %v741_v12, %s633_s10  ;;  %v114_v15 = vmax.f32 %v110_v14, 0.0  ;;  %v228_v63 = vmul.f32 %v568_v57, %v741_v12 }
  0x18   :  { %v747_v17 = vmin.f32 %v114_v15, 6.0 }
  0x1b   :  { %127 = vrot.lane.b32.xlu1 %v745_v16, %s632_s9 }
  0x1e   :  { %123 = vrot.lane.b32.xlu0 %v747_v17, %s632_s9  ;;  %147 = vrot.lane.b32.xlu2 %v747_v17, %s633_s10 }
  0x23   :  { %151 = vrot.lane.b32.xlu1 %v745_v16, %s633_s10 }
  0x26   :  { %149 = vrot.lane.b32.xlu0 %v735_v7, %s633_s10  ;;  %171 = vrot.lane.b32.xlu2 %v741_v12, %s634_s0 }
  0x2b   :  { %175 = vrot.lane.b32.xlu1 %v735_v7, %s634_s0 }
  0x2e   :  { %173 = vrot.lane.b32.xlu0 %v747_v17, %s634_s0  ;;  %177 = vrot.lane.b32.xlu2 %v745_v16, %s634_s0 }
  0x33   :  { %199 = vrot.lane.b32.xlu1 %v747_v17, %s635_s11 }
  0x36   :  { %197 = vrot.lane.b32.xlu0 %v741_v12, %s635_s11  ;;  %201 = vrot.lane.b32.xlu2 %v735_v7, %s635_s11 }
  0x3b   :  { %236 = vrot.lane.b32.xlu1 %v741_v12, %s636_s12 }
  0x3e   :  { %203 = vrot.lane.b32.xlu0 %v745_v16, %s635_s11  ;;  %238 = vrot.lane.b32.xlu2 %v747_v17, %s636_s12 }
  0x43   :  { %242 = vrot.lane.b32.xlu1 %v745_v16, %s636_s12 }
  0x46   :  { %240 = vrot.lane.b32.xlu0 %v735_v7, %s636_s12  ;;  %262 = vrot.lane.b32.xlu2 %v741_v12, %s637_s13 }
  0x4b   :  { %266 = vrot.lane.b32.xlu1 %v735_v7, %s637_s13 }
  0x4e   :  { %264 = vrot.lane.b32.xlu0 %v747_v17, %s637_s13  ;;  %268 = vrot.lane.b32.xlu2 %v745_v16, %s637_s13 }
  0x53   :  { %290 = vrot.lane.b32.xlu1 %v747_v17, %s638_s14 }
  0x56   :  { %288 = vrot.lane.b32.xlu0 %v741_v12, %s638_s14  ;;  %292 = vrot.lane.b32.xlu2 %v735_v7, %s638_s14 }
  0x5b   :  { %314 = vrot.lane.b32.xlu1 %v741_v12, %s639_s15 }
  0x5e   :  { %294 = vrot.lane.b32.xlu0 %v745_v16, %s638_s14  ;;  %316 = vrot.lane.b32.xlu2 %v747_v17, %s639_s15 }
  0x63   :  { %320 = vrot.lane.b32.xlu1 %v745_v16, %s639_s15 }
  0x66   :  { %318 = vrot.lane.b32.xlu0 %v735_v7, %s639_s15 }
  0x70   :  { %v146_v18 = vpop.permute.xlu2 %145 }
  0x78   :  { %v778_v19 = vpop.permute.xlu2 %147 }
  0x79   :  { %v156_v1 = vsel %vm153_vm0, %v146_v18, %v778_v19 }
  0x7a   :  { %v164_v15 = vmul.f32 %v557_v0, %v156_v1 }
  0x80   :  { %v782_v22 = vpop.permute.xlu2 %171 }
  0x85   :  { %v780_v20 = vpop.permute.xlu1 %125 }
  0x88   :  { %v122_v21 = vpop.permute.xlu0 %121  ;;  %v178_v25 = vpop.permute.xlu2 %177 }
  0x89   :  { %v183_v48 = vsel %vm179_vm2, %v178_v25, %v782_v22 }
  0x8a   :  { %v189_v53 = vmul.f32 %v560_v47, %v183_v48 }
  0x8d   :  { %v128_v23 = vpop.permute.xlu1 %127 }
  0x8e   :  { %v135_v44 = vsel %vm131_vm1, %v128_v23, %v122_v21  ;;  %v132_v3 = vsel %vm131_vm1, %v780_v20, %v128_v23  ;;  %v567_v23 = vld [vmem:[%s1220_s1 + $0x118] sm:$0xff] }
  0x8f   :  { %v141_v49 = vmul.f32 %v552_v43, %v135_v44 }
  0x90   :  { %v784_v24 = vpop.permute.xlu0 %123  ;;  %v786_v28 = vpop.permute.xlu2 %201 }
  0x91   :  { %v134_v9 = vsel %vm131_vm1, %v122_v21, %v784_v24 }
  0x92   :  { %v142_v44 = vmul.f32 %v553_v8, %v134_v9 }
  0x94   :  { %v168_v0 = vadd.f32 %v164_v15, %v142_v44 }
  0x95   :  { %v152_v26 = vpop.permute.xlu1 %151 }
  0x96   :  { %v157_v41 = vsel %vm153_vm0, %v152_v26, %v146_v18  ;;  %v558_v18 = vld [vmem:[%s1220_s1 + $0xd0] sm:$0xff] }
  0x97   :  { %v163_v45 = vmul.f32 %v556_v40, %v157_v41  ;;  %v144_v40 = vmul.f32 %v555_v2, %v132_v3  ;;  %v133_v41 = vsel %vm131_vm1, %v784_v24, %v780_v20  ;;  %v575_v2 = vld [vmem:[%s1220_s1 + $0x158] sm:$0xff] }
  0x98   :  { %v150_v27 = vpop.permute.xlu0 %149  ;;  %v794_v32 = vpop.permute.xlu2 %238 }
  0x99   :  { %v167_v52 = vadd.f32 %v163_v45, %v141_v49  ;;  %v154_v61 = vsel %vm153_vm0, %v150_v27, %v152_v26  ;;  %v155_v21 = vsel %vm153_vm0, %v778_v19, %v150_v27  ;;  %v580_v19 = vld [vmem:[%s1220_s1 + $0x180] sm:$0xff]  ;;  %v561_v45 = vld [vmem:[%s1220_s1 + $0xe8] sm:$0xff] }
  0x9a   :  { %v166_v10 = vmul.f32 %v559_v60, %v154_v61  ;;  %v165_v48 = vmul.f32 %v558_v18, %v155_v21 }
  0x9b   :  { %v193_v58 = vadd.f32 %v189_v53, %v167_v52  ;;  %v565_v53 = vld [vmem:[%s1220_s1 + $0x108] sm:$0xff] }
  0x9c   :  { %v170_v49 = vadd.f32 %v166_v10, %v144_v40  ;;  %v579_v40 = vld [vmem:[%s1220_s1 + $0x178] sm:$0xff] }
  0x9d   :  { %v788_v29 = vpop.permute.xlu1 %175 }
  0x9e   :  { %v180_v5 = vsel %vm179_vm2, %v788_v29, %v178_v25 }
  0x9f   :  { %v192_v43 = vmul.f32 %v563_v4, %v180_v5 }
  0xa0   :  { %v790_v30 = vpop.permute.xlu0 %173  ;;  %v800_v37 = vpop.permute.xlu2 %262 }
  0xa1   :  { %v182_v20 = vsel %vm179_vm2, %v782_v22, %v790_v30 }
  0xa2   :  { %v190_v61 = vmul.f32 %v561_v45, %v182_v20 }
  0xa4   :  { %v194_v18 = vadd.f32 %v190_v61, %v168_v0 }
  0xa5   :  { %v792_v31 = vpop.permute.xlu1 %199 }
  0xa8   :  { %v796_v33 = vpop.permute.xlu0 %197  ;;  %v821_v46 = vpop.permute.xlu2 %268 }
  0xa9   :  { %v208_v22 = vsel %vm205_vm3, %v796_v33, %v792_v31 }
  0xaa   :  { %v216_v8 = vmul.f32 %v565_v53, %v208_v22 }
  0xad   :  { %v798_v35 = vpop.permute.xlu1 %236 }
  0xae   :  { %v247_v12 = vsel %vm244_vm4, %v798_v35, %v794_v32 }
  0xaf   :  { %v254_v24 = vmul.f32 %v572_v11, %v247_v12  ;;  %v569_v12 = vld [vmem:[%s1220_s1 + $0x128] sm:$0xff] }
  0xb0   :  { %v204_v36 = vpop.permute.xlu0 %203  ;;  %v843_v59 = vpop.permute.xlu2 %292 }
  0xb1   :  { %v209_v51 = vsel %vm205_vm3, %v204_v36, %v796_v33  ;;  %v206_v25 = vsel %vm205_vm3, %v786_v28, %v204_v36  ;;  %v554_v36 = vld [vmem:[%s1220_s1 + $0xb0] sm:$0xff]  ;;  %v207_v33 = vsel %vm205_vm3, %v792_v31, %v786_v28 }
  0xb2   :  { %v215_v55 = vmul.f32 %v564_v50, %v209_v51  ;;  %v562_v50 = vld [vmem:[%s1220_s1 + $0xf0] sm:$0xff]  ;;  %v181_v51 = vsel %vm179_vm2, %v790_v30, %v788_v29  ;;  %v218_v52 = vmul.f32 %v567_v23, %v206_v25  ;;  %v143_v29 = vmul.f32 %v554_v36, %v133_v41  ;;  %v573_v25 = vld [vmem:[%s1220_s1 + $0x148] sm:$0xff] }
  0xb3   :  { %v196_v30 = vadd.f32 %v192_v43, %v170_v49  ;;  %v191_v1 = vmul.f32 %v562_v50, %v181_v51  ;;  %v274_v41 = vsel %vm270_vm5, %v821_v46, %v800_v37  ;;  %v229_v36 = vmul.f32 %v569_v12, %v747_v17  ;;  %v583_v49 = vld [vmem:[%s1220_s1 + $0x198] sm:$0xff]  ;;  %v581_v50 = vld [vmem:[%s1220_s1 + $0x188] sm:$0xff] }
  0xb4   :  { %v219_v62 = vadd.f32 %v215_v55, %v193_v58  ;;  %v571_v55 = vld [vmem:[%s1220_s1 + $0x138] sm:$0xff]  ;;  %v169_v10 = vadd.f32 %v165_v48, %v143_v29  ;;  %v283_v48 = vmul.f32 %v579_v40, %v274_v41  ;;  %v582_v29 = vld [vmem:[%s1220_s1 + $0x190] sm:$0xff] }
  0xb5   :  { %v806_v39 = vpop.permute.xlu1 %242  ;;  %v222_v9 = vadd.f32 %v218_v52, %v196_v30  ;;  %v231_v28 = vmul.f32 %v571_v55, %v745_v16  ;;  %v340_v16 = vld [vmem:[%s1221_s2] sm:$0xff] }
  0xb6   :  { %v232_v26 = vadd.f32 %v228_v63, %v219_v62  ;;  %v566_v62 = vld [vmem:[%s1220_s1 + $0x110] sm:$0xff]  ;;  %v584_v63 = vld [vmem:[%s1220_s1 + $0x1a0] sm:$0xff]  ;;  %v248_v3 = vsel %vm244_vm4, %v806_v39, %v798_v35  ;;  %v195_v23 = vadd.f32 %v191_v1, %v169_v10  ;;  %v585_v10 = vld [vmem:[%s1220_s1 + $0x1a8] sm:$0xff] }
  0xb7   :  { %v217_v11 = vmul.f32 %v566_v62, %v207_v33  ;;  %v570_v35 = vld [vmem:[%s1220_s1 + $0x130] sm:$0xff]  ;;  %v257_v21 = vmul.f32 %v575_v2, %v248_v3  ;;  %v588_v1 = vld [vmem:[%s1221_s2 + $0x20] sm:$0xff] }
  0xb8   :  { %v814_v42 = vpop.permute.xlu0 %240  ;;  %v258_v57 = vadd.f32 %v254_v24, %v232_v26  ;;  %v947_v60 = vpop.permute.xlu2 %316  ;;  %v230_v44 = vmul.f32 %v570_v35, %v735_v7  ;;  %v592_v2 = vld [vmem:[%s1221_s2 + $0x40] sm:$0xff] }
  0xb9   :  { %v246_v26 = vsel %vm244_vm4, %v794_v32, %v814_v42  ;;  %v221_v45 = vadd.f32 %v217_v11, %v195_v23  ;;  %v574_v32 = vld [vmem:[%s1220_s1 + $0x150] sm:$0xff]  ;;  %v245_v20 = vsel %vm244_vm4, %v814_v42, %v806_v39  ;;  %v343_v23 = vld [vmem:[%s1221_s2 + $0x18] sm:$0xff] }
  0xba   :  { %v578_v42 = vld [vmem:[%s1220_s1 + $0x170] sm:$0xff]  ;;  %v256_v22 = vmul.f32 %v574_v32, %v245_v20 }
  0xbd   :  { %v836_v54 = vpop.permute.xlu1 %266 }
  0xc0   :  { %v838_v56 = vpop.permute.xlu0 %264 }
  0xc1   :  { %v273_v14 = vsel %vm270_vm5, %v800_v37, %v838_v56  ;;  %v577_v37 = vld [vmem:[%s1220_s1 + $0x168] sm:$0xff]  ;;  %v272_v17 = vsel %vm270_vm5, %v838_v56, %v836_v54  ;;  %v271_v56 = vsel %vm270_vm5, %v836_v54, %v821_v46  ;;  %v234_v54 = vadd.f32 %v230_v44, %v221_v45  ;;  %v342_v44 = vld [vmem:[%s1221_s2 + $0x10] sm:$0xff] }
  0xc2   :  { %v280_v47 = vmul.f32 %v576_v13, %v273_v14  ;;  %v281_v55 = vmul.f32 %v577_v37, %v272_v17  ;;  %v604_v17 = vld [vmem:[%s1221_s2 + $0xa0] sm:$0xff] }
  0xc4   :  { %v284_v4 = vadd.f32 %v280_v47, %v258_v57  ;;  %v255_v47 = vmul.f32 %v573_v25, %v246_v26  ;;  %v587_v57 = vld [vmem:[%s1220_s1 + $0x1b8] sm:$0xff] }
  0xc5   :  { %v871_v6 = vpop.permute.xlu1 %290 }
  0xc6   :  { %v298_v51 = vsel %vm296_vm6, %v871_v6, %v843_v59 }
  0xc7   :  { %v307_v0 = vmul.f32 %v581_v50, %v298_v51  ;;  %v591_v50 = vld [vmem:[%s1221_s2 + $0x38] sm:$0xff] }
  0xc8   :  { %v906_v34 = vpop.permute.xlu0 %288  ;;  %v595_v51 = vld [vmem:[%s1221_s2 + $0x58] sm:$0xff] }
  0xc9   :  { %v299_v27 = vsel %vm296_vm6, %v906_v34, %v871_v6 }
  0xca   :  { %v306_v58 = vmul.f32 %v580_v19, %v299_v27  ;;  %v220_v19 = vadd.f32 %v216_v8, %v194_v18  ;;  %v235_v27 = vadd.f32 %v231_v28, %v222_v9  ;;  %v260_v8 = vadd.f32 %v256_v22, %v234_v54  ;;  %v596_v28 = vld [vmem:[%s1221_s2 + $0x60] sm:$0xff]  ;;  %v599_v54 = vld [vmem:[%s1221_s2 + $0x78] sm:$0xff] }
  0xcc   :  { %v310_v13 = vadd.f32 %v306_v58, %v284_v4  ;;  %v261_v24 = vadd.f32 %v257_v21, %v235_v27  ;;  %v233_v53 = vadd.f32 %v229_v36, %v220_v19 }
  0xcd   :  { %v315_v5 = vpop.permute.xlu1 %314 }
  0xce   :  { %v325_v31 = vsel %vm322_vm7, %v315_v5, %v947_v60  ;;  %v259_v62 = vadd.f32 %v255_v47, %v233_v53  ;;  %v287_v33 = vadd.f32 %v283_v48, %v261_v24 }
  0xcf   :  { %v332_v14 = vmul.f32 %v584_v63, %v325_v31  ;;  %v282_v63 = vmul.f32 %v578_v42, %v271_v56 }
  0xd0   :  { %v295_v15 = vpop.permute.xlu0 %294  ;;  %v285_v9 = vadd.f32 %v281_v55, %v259_v62 }
  0xd1   :  { %v336_v43 = vadd.f32 %v332_v14, %v310_v13  ;;  %v300_v39 = vsel %vm296_vm6, %v295_v15, %v906_v34  ;;  %v297_v6 = vsel %vm296_vm6, %v843_v59, %v295_v15  ;;  %v586_v14 = vld [vmem:[%s1220_s1 + $0x1b0] sm:$0xff]  ;;  %v286_v18 = vadd.f32 %v282_v63, %v260_v8 }
  0xd2   :  { %v309_v30 = vmul.f32 %v583_v49, %v300_v39  ;;  %v308_v31 = vmul.f32 %v582_v29, %v297_v6  ;;  %v311_v21 = vadd.f32 %v307_v0, %v285_v9 }
  0xd3   :  { %v344_v7 = vadd.f32 %v340_v16, %v336_v43 }
  0xd4   :  { %v313_v13 = vadd.f32 %v309_v30, %v287_v33  ;;  %v312_v43 = vadd.f32 %v308_v31, %v286_v18  ;;  %v603_v30 = vld [vmem:[%s1221_s2 + $0x98] sm:$0xff]  ;;  %v594_v18 = vld [vmem:[%s1221_s2 + $0x50] sm:$0xff] }
  0xd5   :  { %v348_v52 = vmax.f32 %v344_v7, 0.0  ;;  %v321_v34 = vpop.permute.xlu1 %320 }
  0xd6   :  { %v326_v46 = vsel %vm322_vm7, %v321_v34, %v315_v5 }
  0xd7   :  { %v1034_v58 = vmin.f32 %v348_v52, 6.0  ;;  %v335_v5 = vmul.f32 %v587_v57, %v326_v46  ;;  %v608_v52 = vld [vmem:[%s1221_s2 + $0xc0] sm:$0xff] }
  0xd8   :  { %v319_v61 = vpop.permute.xlu0 %318  ;;  %v612_v57 = vld [vmem:[%s1221_s2 + $0xe0] sm:$0xff] }
  0xd9   :  { %v361_v3 = vperm.slane %v1034_v58, 0  ;;  %v374_v4 = vperm.slane %v1034_v58, 1  ;;  %v391_v59 = vperm.slane %v1034_v58, 2  ;;  %v324_v11 = vsel %vm322_vm7, %v947_v60, %v319_v61  ;;  %v600_v60 = vld [vmem:[%s1221_s2 + $0x80] sm:$0xff] }
  0xda   :  { %v323_v15 = vsel %vm322_vm7, %v319_v61, %v321_v34  ;;  %v408_v16 = vperm.slane %v1034_v58, 3  ;;  %v339_v40 = vadd.f32 %v335_v5, %v313_v13  ;;  %v333_v41 = vmul.f32 %v585_v10, %v324_v11  ;;  %v589_v10 = vld [vmem:[%s1221_s2 + $0x28] sm:$0xff]  ;;  %v590_v11 = vld [vmem:[%s1221_s2 + $0x30] sm:$0xff] }
  0xdb   :  { %v365_v12 = vmul.f32 %v588_v1, %v361_v3  ;;  %v378_v35 = vmul.f32 %v592_v2, %v374_v4  ;;  %v395_v26 = vmul.f32 %v596_v28, %v391_v59  ;;  %v334_v19 = vmul.f32 %v586_v14, %v323_v15  ;;  %v607_v2 = vld [vmem:[%s1221_s2 + $0xb8] sm:$0xff]  ;;  %v593_v15 = vld [vmem:[%s1221_s2 + $0x48] sm:$0xff] }
  0xdc   :  { %v347_v36 = vadd.f32 %v343_v23, %v339_v40  ;;  %v337_v45 = vadd.f32 %v333_v41, %v311_v21  ;;  %v412_v32 = vmul.f32 %v600_v60, %v408_v16  ;;  %v425_v20 = vperm.slane %v1034_v58, 4  ;;  %v611_v3 = vld [vmem:[%s1221_s2 + $0xd8] sm:$0xff]  ;;  %v597_v21 = vld [vmem:[%s1221_s2 + $0x68] sm:$0xff]  ;;  %v598_v23 = vld [vmem:[%s1221_s2 + $0x70] sm:$0xff] }
  0xdd   :  { %v382_v25 = vadd.f32 %v378_v35, %v365_v12  ;;  %v338_v37 = vadd.f32 %v334_v19, %v312_v43  ;;  %v442_v42 = vperm.slane %v1034_v58, 5  ;;  %v459_v56 = vperm.slane %v1034_v58, 6 }
  0xde   :  { %v351_v7 = vmax.f32 %v347_v36, 0.0  ;;  %v345_v24 = vadd.f32 %v341_v38, %v337_v45  ;;  %v429_v39 = vmul.f32 %v604_v17, %v425_v20  ;;  %v476_v1 = vperm.slane %v1034_v58, 7  ;;  %v619_v36 = vld [vmem:[%s1221_s2 + $0x118] sm:$0xff]  ;;  %v601_v17 = vld [vmem:[%s1221_s2 + $0x88] sm:$0xff]  ;;  %v620_v58 = vld [vmem:[%s1221_s2 + $0x120] sm:$0xff] }
  0xdf   :  { %v399_v27 = vadd.f32 %v395_v26, %v382_v25  ;;  %v346_v48 = vadd.f32 %v342_v44, %v338_v37  ;;  %v446_v0 = vmul.f32 %v608_v52, %v442_v42  ;;  %v1117_v4 = vmul.f32 %v612_v57, %v459_v56 }
  0xe0   :  { %v1082_v49 = vmin.f32 %v351_v7, 6.0  ;;  %v349_v55 = vmax.f32 %v345_v24, 0.0  ;;  %v602_v7 = vld [vmem:[%s1221_s2 + $0x90] sm:$0xff] }
  0xe1   :  { %v416_v47 = vadd.f32 %v412_v32, %v399_v27  ;;  %v350_v6 = vmax.f32 %v346_v48, 0.0  ;;  %v615_v27 = vld [vmem:[%s1221_s2 + $0xf8] sm:$0xff] }
  0xe2   :  { %v364_v34 = vperm.slane %v1082_v49, 0  ;;  %v377_v53 = vperm.slane %v1082_v49, 1  ;;  %v394_v22 = vperm.slane %v1082_v49, 2  ;;  %v411_v29 = vperm.slane %v1082_v49, 3 }
  0xe3   :  { %v433_v46 = vadd.f32 %v429_v39, %v416_v47  ;;  %v428_v33 = vperm.slane %v1082_v49, 4  ;;  %v445_v63 = vperm.slane %v1082_v49, 5  ;;  %v1119_v8 = vmin.f32 %v349_v55, 6.0  ;;  %v606_v39 = vld [vmem:[%s1221_s2 + $0xb0] sm:$0xff]  ;;  %v609_v55 = vld [vmem:[%s1221_s2 + $0xc8] sm:$0xff] }
  0xe4   :  { %v368_v61 = vmul.f32 %v591_v50, %v364_v34  ;;  %v381_v62 = vmul.f32 %v595_v51, %v377_v53  ;;  %v398_v5 = vmul.f32 %v599_v54, %v394_v22  ;;  %v415_v28 = vmul.f32 %v603_v30, %v411_v29  ;;  %v610_v30 = vld [vmem:[%s1221_s2 + $0xd0] sm:$0xff] }
  0xe5   :  { %v450_v9 = vadd.f32 %v446_v0, %v433_v46  ;;  %v462_v31 = vperm.slane %v1082_v49, 6  ;;  %v1128_v12 = vmin.f32 %v350_v6, 6.0  ;;  %v432_v13 = vmul.f32 %v607_v2, %v428_v33  ;;  %v623_v0 = vld [vmem:[%s1221_s2 + $0x138] sm:$0xff] }
  0xe6   :  { %v385_v59 = vadd.f32 %v381_v62, %v368_v61  ;;  %v449_v14 = vmul.f32 %v611_v3, %v445_v63  ;;  %v362_v16 = vperm.slane %v1119_v8, 0  ;;  %v375_v25 = vperm.slane %v1119_v8, 1  ;;  %v616_v63 = vld [vmem:[%s1221_s2 + $0x100] sm:$0xff] }
  0xe7   :  { %v363_v60 = vperm.slane %v1128_v12, 0  ;;  %v376_v26 = vperm.slane %v1128_v12, 1  ;;  %v392_v40 = vperm.slane %v1119_v8, 2  ;;  %v479_v43 = vperm.slane %v1082_v49, 7  ;;  %v605_v49 = vld [vmem:[%s1221_s2 + $0xa8] sm:$0xff] }
  0xe8   :  { %v402_v35 = vadd.f32 %v398_v5, %v385_v59  ;;  %v366_v38 = vmul.f32 %v589_v10, %v362_v16  ;;  %v393_v19 = vperm.slane %v1128_v12, 2  ;;  %v379_v45 = vmul.f32 %v593_v15, %v375_v25  ;;  %v613_v10 = vld [vmem:[%s1221_s2 + $0xe8] sm:$0xff]  ;;  %v507_v16 = vld.sshfl [vmem:[#allocation1 + $0x18] sm:$0xff pattern:$0x75316420] }
  0xe9   :  { %v367_v44 = vmul.f32 %v590_v11, %v363_v60  ;;  %v380_v32 = vmul.f32 %v594_v18, %v376_v26  ;;  %v396_v20 = vmul.f32 %v597_v21, %v392_v40  ;;  %v409_v47 = vperm.slane %v1119_v8, 3  ;;  %v614_v11 = vld [vmem:[%s1221_s2 + $0xf0] sm:$0xff] }
  0xea   :  { %v419_v41 = vadd.f32 %v415_v28, %v402_v35  ;;  %v397_v24 = vmul.f32 %v598_v23, %v393_v19  ;;  %v410_v48 = vperm.slane %v1128_v12, 3  ;;  %v383_v42 = vadd.f32 %v379_v45, %v366_v38  ;;  %v618_v60 = vld [vmem:[%s1221_s2 + $0x110] sm:$0xff] }
  0xeb   :  { %v384_v56 = vadd.f32 %v380_v32, %v367_v44  ;;  %v426_v50 = vperm.slane %v1119_v8, 4  ;;  %v427_v51 = vperm.slane %v1128_v12, 4  ;;  %v466_v34 = vmul.f32 %v615_v27, %v462_v31  ;;  %v505_v32 = vld.sshfl [vmem:[#allocation1 + $0x8] sm:$0xff pattern:$0x75316420] }
  0xec   :  { %v436_v37 = vadd.f32 %v432_v13, %v419_v41  ;;  %v483_v53 = vmul.f32 %v619_v36, %v479_v43  ;;  %v443_v22 = vperm.slane %v1119_v8, 5  ;;  %v400_v57 = vadd.f32 %v396_v20, %v383_v42  ;;  %v506_v20 = vld.sshfl [vmem:[#allocation1 + $0x10] sm:$0xff pattern:$0x75316420] }
  0xed   :  { %v401_v46 = vadd.f32 %v397_v24, %v384_v56  ;;  %v413_v54 = vmul.f32 %v601_v17, %v409_v47  ;;  %v414_v29 = vmul.f32 %v602_v7, %v410_v48  ;;  %v430_v61 = vmul.f32 %v605_v49, %v426_v50  ;;  %v504_v47 = vld.sshfl [vmem:[#allocation1] sm:$0xff pattern:$0x75316420] }
  0xee   :  { %v453_v52 = vadd.f32 %v449_v14, %v436_v37  ;;  %v431_v62 = vmul.f32 %v606_v39, %v427_v51  ;;  %v444_v33 = vperm.slane %v1128_v12, 5  ;;  %v460_v59 = vperm.slane %v1119_v8, 6  ;;  %v617_v14 = vld [vmem:[%s1221_s2 + $0x108] sm:$0xff] }
  0xef   :  { %v417_v2 = vadd.f32 %v413_v54, %v400_v57  ;;  %v418_v3 = vadd.f32 %v414_v29, %v401_v46  ;;  %v461_v5 = vperm.slane %v1128_v12, 6  ;;  %v467_v28 = vadd.f32 %v1117_v4, %v450_v9 }
  0xf0   :  { %v470_v6 = vadd.f32 %v466_v34, %v453_v52  ;;  %v447_v35 = vmul.f32 %v609_v55, %v443_v22  ;;  %v477_v13 = vperm.slane %v1119_v8, 7  ;;  %v448_v21 = vmul.f32 %v610_v30, %v444_v33 }
  0xf1   :  { %v434_v15 = vadd.f32 %v430_v61, %v417_v2  ;;  %v435_v18 = vadd.f32 %v431_v62, %v418_v3  ;;  %v478_v4 = vperm.slane %v1128_v12, 7  ;;  %v480_v9 = vmul.f32 %v616_v63, %v476_v1  ;;  %v621_v1 = vld [vmem:[%s1221_s2 + $0x128] sm:$0xff]  ;;  %v622_v12 = vld [vmem:[%s1221_s2 + $0x130] sm:$0xff] }
  0xf2   :  { %v487_v31 = vadd.f32 %v483_v53, %v470_v6  ;;  %v464_v26 = vmul.f32 %v613_v10, %v460_v59  ;;  %v465_v40 = vmul.f32 %v614_v11, %v461_v5  ;;  %v481_v43 = vmul.f32 %v617_v14, %v477_v13 }
  0xf3   :  { %v451_v25 = vadd.f32 %v447_v35, %v434_v15  ;;  %v452_v8 = vadd.f32 %v448_v21, %v435_v18  ;;  %v484_v41 = vadd.f32 %v480_v9, %v467_v28  ;;  %v482_v36 = vmul.f32 %v618_v60, %v478_v4 }
  0xf4   :  { %v496_v23 = vadd.f32 %v623_v0, %v487_v31 }
  0xf5   :  { %v468_v19 = vadd.f32 %v464_v26, %v451_v25  ;;  %v469_v27 = vadd.f32 %v465_v40, %v452_v8  ;;  %v493_v37 = vadd.f32 %v620_v58, %v484_v41 }
  0xf6   :  { %v515_v38 = vadd.f32 %v507_v16, %v496_v23 }
  0xf7   :  { %v485_v44 = vadd.f32 %v481_v43, %v468_v19  ;;  %v486_v45 = vadd.f32 %v482_v36, %v469_v27  ;;  %v512_v39 = vadd.f32 %v504_v47, %v493_v37 }
  0xf8   :  { %v521_v17 = vrot.slane %v515_v38, 4 }
  0xf9   :  { %v494_v7 = vadd.f32 %v621_v1, %v485_v44  ;;  %v495_v24 = vadd.f32 %v622_v12, %v486_v45 }
  0xfb   :  { %v513_v48 = vadd.f32 %v505_v32, %v494_v7  ;;  %v514_v49 = vadd.f32 %v506_v20, %v495_v24 }
  0xfd   :  { %v520_v42 = vrot.slane %v513_v48, 4  ;;  %v524_v56 = vsel %vm522_vm8, %v514_v49, %v521_v17 }
  0xfe   :  { %528 = vst [vmem:[%s1222_s3 + $0x8] sm:$0xff] %v524_v56 }
  0xff   :  { %v523_v50 = vsel %vm522_vm8, %v512_v39, %v520_v42 }
 0x100   :  { %527 = vst [vmem:[%s1222_s3] sm:$0xff] %v523_v50 }

</bundles_post_ra>
